<compile_context>
chip_gen: v5e
topology: v5e:2x2
jax: 0.10.0
libtpu: 0.0.40
codegen_flags: <defaults>
</compile_context>

<pallas_src>
import functools
import math

import jax
import jax.numpy as jnp
from jax.experimental import pallas as pl
from jax.experimental.pallas import tpu as pltpu


_VMEM_LIMIT = 48 * 1024 * 1024


# ------------------- fused (batch x depth) decoder kernel -------------------

def _decoder_kernel(x_ref,
                    ln1g_ref, ln1b_ref,
                    qkvw_ref, qkvb_ref,
                    projw_ref, projb_ref,
                    ln2g_ref, ln2b_ref,
                    fc1w_ref, fc1b_ref,
                    fc2w_ref, fc2b_ref,
                    o_ref,
                    attn_ref,
                    *, heads, eps):
    d = pl.program_id(1)

    # Load activations from HBM once per batch example; afterwards they stay
    # resident in the output VMEM block across the depth ("arbitrary") axis.
    @pl.when(d == 0)
    def _():
        o_ref[...] = x_ref[...]

    x = o_ref[0].astype(jnp.float32)                   # (N, D)
    D = x.shape[-1]
    dh = D // heads

    def layernorm(v, g, b):
        mu = jnp.mean(v, axis=-1, keepdims=True)
        c = v - mu
        var = jnp.mean(c * c, axis=-1, keepdims=True)
        return c * jax.lax.rsqrt(var + eps) * g + b

    # ---------------- attention sub-block (pre-LN) ----------------
    y = layernorm(x, ln1g_ref[0], ln1b_ref[0])
    qkv = jnp.dot(y.astype(jnp.bfloat16), qkvw_ref[0],
                  preferred_element_type=jnp.float32) + qkvb_ref[0]   # (N, 3D)
    # 1/sqrt(dh) is already folded into the Q columns of qkv_w / qkv_b.
    q = qkv[:, 0 * D:1 * D]
    k = qkv[:, 1 * D:2 * D]
    v = qkv[:, 2 * D:3 * D]

    # TODO(synk): at production heads=12 convert this static unroll into a
    # fori_loop / head grid axis to strictly bound the (N, N) s/p live ranges.
    for h in range(heads):                             # static unroll over heads
        sl = slice(h * dh, (h + 1) * dh)
        qh = q[:, sl].astype(jnp.bfloat16)
        kh = k[:, sl].astype(jnp.bfloat16)
        vh = v[:, sl].astype(jnp.bfloat16)
        # Contract over dh -> (N, N); no explicit transpose of k.
        s = jax.lax.dot_general(qh, kh, (((1,), (1,)), ((), ())),
                                preferred_element_type=jnp.float32)
        s = s - jnp.max(s, axis=-1, keepdims=True)
        p = jnp.exp(s)
        p = p * pl.reciprocal(jnp.sum(p, axis=-1, keepdims=True), approx=True)
        # Store this head's PV result straight into the VMEM scratch slice;
        # no lane-axis concatenate, per-head temporaries die here.
        attn_ref[:, sl] = jnp.dot(p.astype(jnp.bfloat16), vh,
                                  preferred_element_type=jnp.float32)

    a = jnp.dot(attn_ref[...].astype(jnp.bfloat16), projw_ref[0],
                preferred_element_type=jnp.float32) + projb_ref[0]
    x = x + a                                          # residual 1

    # ---------------- MLP sub-block (pre-LN) ----------------
    y = layernorm(x, ln2g_ref[0], ln2b_ref[0])
    h1 = jnp.dot(y.astype(jnp.bfloat16), fc1w_ref[0],
                 preferred_element_type=jnp.float32) + fc1b_ref[0]
    # TODO(synk): tanh-approx GELU; torch nn.GELU default is exact erf.
    h1 = 0.5 * h1 * (1.0 + jnp.tanh(
        0.7978845608028654 * (h1 + 0.044715 * h1 * h1 * h1)))
    h2 = jnp.dot(h1.astype(jnp.bfloat16), fc2w_ref[0],
                 preferred_element_type=jnp.float32) + fc2b_ref[0]
    o_ref[0] = (x + h2).astype(o_ref.dtype)            # residual 2


def decoder(x, p, heads, eps=1e-6):
    """Whole decoder (all blocks) in one pallas_call: (B, N, D) -> (B, N, D)."""
    B, N, D = x.shape
    depth = p["qkv_w"].shape[0]
    Hid = p["fc1_w"].shape[2]

    def wspec(shape):
        # Per-block weights: indexed by the depth grid axis only.
        return pl.BlockSpec((1,) + shape, lambda b, d: (d, 0, 0))

    kernel = functools.partial(_decoder_kernel, heads=heads, eps=eps)
    return pl.pallas_call(
        kernel,
        grid=(B, depth),
        in_specs=[
            pl.BlockSpec((1, N, D), lambda b, d: (b, 0, 0)),   # activations
            wspec((1, D)), wspec((1, D)),                      # ln1 gamma/beta
            wspec((D, 3 * D)), wspec((1, 3 * D)),              # qkv (Q pre-scaled)
            wspec((D, D)), wspec((1, D)),                      # proj
            wspec((1, D)), wspec((1, D)),                      # ln2 gamma/beta
            wspec((D, Hid)), wspec((1, Hid)),                  # fc1
            wspec((Hid, D)), wspec((1, D)),                    # fc2
        ],
        out_specs=pl.BlockSpec((1, N, D), lambda b, d: (b, 0, 0)),
        out_shape=jax.ShapeDtypeStruct((B, N, D), jnp.float32),
        scratch_shapes=[pltpu.VMEM((N, D), jnp.float32)],      # head outputs
        compiler_params=pltpu.CompilerParams(
            dimension_semantics=("parallel", "arbitrary"),
            vmem_limit_bytes=_VMEM_LIMIT),
    )(x,
      p["ln1_g"], p["ln1_b"],
      p["qkv_w"], p["qkv_b"],
      p["proj_w"], p["proj_b"],
      p["ln2_g"], p["ln2_b"],
      p["fc1_w"], p["fc1_b"],
      p["fc2_w"], p["fc2_b"])


# ------------------- fused F.normalize(dim=2) + matmul ----------------------

def _norm_classify_kernel(x_ref, c_ref, o_ref, *, eps):
    x = x_ref[...]                                         # (tm, D) f32
    ss = jnp.sum(x * x, axis=-1, keepdims=True)
    # x * rsqrt(max(ss, eps^2)) == x / max(||x||, eps)   (F.normalize semantics)
    xn = x * jax.lax.rsqrt(jnp.maximum(ss, eps * eps))
    o_ref[...] = jnp.dot(xn.astype(jnp.bfloat16), c_ref[...],
                         preferred_element_type=jnp.float32).astype(o_ref.dtype)


def normalize_classify(x2d, cls_emb_padded, *, tile_m=512, eps=1e-12):
    M, D = x2d.shape
    P = cls_emb_padded.shape[1]                            # lane-padded n_cls
    tm = min(tile_m, M)
    grid_m = pl.cdiv(M, tm)
    return pl.pallas_call(
        functools.partial(_norm_classify_kernel, eps=eps),
        grid=(grid_m,),
        in_specs=[
            pl.BlockSpec((tm, D), lambda i: (i, 0)),
            # Constant-index weight block: fetched once, single-buffered.
            pl.BlockSpec((D, P), lambda i: (0, 0),
                         pipeline_mode=pl.Buffered(1)),
        ],
        out_specs=pl.BlockSpec((tm, P), lambda i: (i, 0)),
        out_shape=jax.ShapeDtypeStruct((M, P), jnp.float32),
        compiler_params=pltpu.CompilerParams(
            dimension_semantics=("parallel",),
            vmem_limit_bytes=_VMEM_LIMIT),
    )(x2d, cls_emb_padded)


# ------------------------------- forward -------------------------------------

def precompute_cls_embedding(params, heads, lane_pad=128):
    """Decode the (input-independent) cls embedding once: (D, n_cls_padded) bf16."""
    cls = decoder(params["cls_embedding"], params["blocks"], heads)  # (1, n_cls, D)
    cls_t = jnp.transpose(cls[0], (1, 0))                            # (D, n_cls)
    n_cls = cls_t.shape[1]
    pad = (-n_cls) % lane_pad
    cls_t = jnp.pad(cls_t, ((0, 0), (0, pad)))                       # lane-dense
    return cls_t.astype(jnp.bfloat16)


def mask_transformer_forward(x, params, cls_emb_padded, heads, n_cls,
                             classify_tile_m=512):
    """Mirrors MaskTransformer.forward (cls decode precomputed/hoisted)."""
    B, N, D = x.shape
    x = decoder(x, params["blocks"], heads)                # self.trasformer(x)
    logits = normalize_classify(x.reshape(B * N, D), cls_emb_padded,
                                tile_m=classify_tile_m)
    return logits[:, :n_cls].reshape(B, N, n_cls)          # drop lane padding


# --------------------------- parameter init ---------------------------------

def init_params(key, *, depth, dim, heads, mlp_ratio, n_cls):
    hidden = dim * mlp_ratio
    blocks = []
    k = key

    def nrm(kk, shape, scale=0.02):
        return scale * jax.random.normal(kk, shape, jnp.float32)

    for _ in range(depth):
        k, k0, k1, k2, k3 = jax.random.split(k, 5)
        blocks.append(dict(
            ln1_g=jnp.ones((dim,), jnp.float32),
            ln1_b=jnp.zeros((dim,), jnp.float32),
            qkv_w=nrm(k0, (dim, 3 * dim)),
            qkv_b=jnp.zeros((3 * dim,), jnp.float32),
            proj_w=nrm(k1, (dim, dim)),
            proj_b=jnp.zeros((dim,), jnp.float32),
            ln2_g=jnp.ones((dim,), jnp.float32),
            ln2_b=jnp.zeros((dim,), jnp.float32),
            fc1_w=nrm(k2, (dim, hidden)),
            fc1_b=jnp.zeros((hidden,), jnp.float32),
            fc2_w=nrm(k3, (hidden, dim)),
            fc2_b=jnp.zeros((dim,), jnp.float32),
        ))
    k, kc = jax.random.split(k)
    # nn.Parameter(torch.rand((1, cls, embedding_dim)))  -> uniform [0, 1)
    cls_embedding = jax.random.uniform(kc, (1, n_cls, dim), jnp.float32)
    return dict(blocks=blocks, cls_embedding=cls_embedding)


def prep_params(raw, heads):
    """One-time prep: stack weights along depth, fold 1/sqrt(dh) into the Q
    columns of qkv (weights AND bias), bf16 matmul weights, lane-shaped biases."""
    blocks = raw["blocks"]
    D = blocks[0]["qkv_w"].shape[0]
    Hid = blocks[0]["fc1_w"].shape[1]
    dh = D // heads
    qscale = jnp.concatenate([jnp.full((D,), 1.0 / math.sqrt(dh), jnp.float32),
                              jnp.ones((2 * D,), jnp.float32)])

    def stack(fn):
        return jnp.stack([fn(p) for p in blocks], axis=0)

    stacked = dict(
        ln1_g=stack(lambda p: p["ln1_g"].reshape(1, D).astype(jnp.float32)),
        ln1_b=stack(lambda p: p["ln1_b"].reshape(1, D).astype(jnp.float32)),
        qkv_w=stack(lambda p: (p["qkv_w"] * qscale).astype(jnp.bfloat16)),
        qkv_b=stack(lambda p: (p["qkv_b"] * qscale).reshape(1, 3 * D)
                    .astype(jnp.float32)),
        proj_w=stack(lambda p: p["proj_w"].astype(jnp.bfloat16)),
        proj_b=stack(lambda p: p["proj_b"].reshape(1, D).astype(jnp.float32)),
        ln2_g=stack(lambda p: p["ln2_g"].reshape(1, D).astype(jnp.float32)),
        ln2_b=stack(lambda p: p["ln2_b"].reshape(1, D).astype(jnp.float32)),
        fc1_w=stack(lambda p: p["fc1_w"].astype(jnp.bfloat16)),
        fc1_b=stack(lambda p: p["fc1_b"].reshape(1, Hid).astype(jnp.float32)),
        fc2_w=stack(lambda p: p["fc2_w"].astype(jnp.bfloat16)),
        fc2_b=stack(lambda p: p["fc2_b"].reshape(1, D).astype(jnp.float32)),
    )
    return dict(blocks=stacked, cls_embedding=raw["cls_embedding"])


# --------------------------------- main --------------------------------------

if __name__ == "__main__":
    key = jax.random.PRNGKey(0)
    kx, kp = jax.random.split(key)

    B, N, D = 2, 8, 32          # batch, tokens, embedding_dim
    HEADS = 4
    N_CLS = 4                   # self.cls
    DEPTH = 2

    x = jax.random.normal(kx, (B, N, D), jnp.float32)
    raw_params = init_params(kp, depth=DEPTH, dim=D, heads=HEADS, mlp_ratio=4,
                             n_cls=N_CLS)
    params = prep_params(raw_params, HEADS)

    # cls-embedding decode is input independent: compute once, reuse per call.
    cls_emb = precompute_cls_embedding(params, HEADS)

    # classify_tile_m=8 -> two "parallel" token tiles at the toy M = B*N = 16.
    fwd = jax.jit(functools.partial(mask_transformer_forward,
                                    heads=HEADS, n_cls=N_CLS,
                                    classify_tile_m=8))
    out = fwd(x, params, cls_emb)
    jax.block_until_ready(out)

    assert out.shape == (B, N, N_CLS)
    assert bool(jnp.all(jnp.isfinite(out)))
    print("KERNEL_OK")
</pallas_src>

<mosaic_0001>
module attributes {stable_mosaic.version = 11 : i64} {
  func.func @_decoder_kernel(%arg0: i32, %arg1: i32, %arg2: memref<1x4x32xf32, #tpu.memory_space<vmem>>, %arg3: memref<1x1x32xf32, #tpu.memory_space<vmem>>, %arg4: memref<1x1x32xf32, #tpu.memory_space<vmem>>, %arg5: memref<1x32x96xbf16, #tpu.memory_space<vmem>>, %arg6: memref<1x1x96xf32, #tpu.memory_space<vmem>>, %arg7: memref<1x32x32xbf16, #tpu.memory_space<vmem>>, %arg8: memref<1x1x32xf32, #tpu.memory_space<vmem>>, %arg9: memref<1x1x32xf32, #tpu.memory_space<vmem>>, %arg10: memref<1x1x32xf32, #tpu.memory_space<vmem>>, %arg11: memref<1x32x128xbf16, #tpu.memory_space<vmem>>, %arg12: memref<1x1x128xf32, #tpu.memory_space<vmem>>, %arg13: memref<1x128x32xbf16, #tpu.memory_space<vmem>>, %arg14: memref<1x1x32xf32, #tpu.memory_space<vmem>>, %arg15: memref<1x4x32xf32, #tpu.memory_space<vmem>>, %arg16: memref<4x32xf32, #tpu.memory_space<vmem>>) attributes {dimension_semantics = [#tpu.dimension_semantics<parallel>, #tpu.dimension_semantics<arbitrary>], iteration_bounds = array<i64: 1, 2>, scalar_prefetch = 0 : i64, scratch_operands = 1 : i64, tpu.core_type = #tpu.core_type<tc>, window_params = [{transform_indices = @transform_0, window_bounds = array<i64: 1, 4, 32>}, {transform_indices = @transform_1, window_bounds = array<i64: 1, 1, 32>}, {transform_indices = @transform_2, window_bounds = array<i64: 1, 1, 32>}, {transform_indices = @transform_3, window_bounds = array<i64: 1, 32, 96>}, {transform_indices = @transform_4, window_bounds = array<i64: 1, 1, 96>}, {transform_indices = @transform_5, window_bounds = array<i64: 1, 32, 32>}, {transform_indices = @transform_6, window_bounds = array<i64: 1, 1, 32>}, {transform_indices = @transform_7, window_bounds = array<i64: 1, 1, 32>}, {transform_indices = @transform_8, window_bounds = array<i64: 1, 1, 32>}, {transform_indices = @transform_9, window_bounds = array<i64: 1, 32, 128>}, {transform_indices = @transform_10, window_bounds = array<i64: 1, 1, 128>}, {transform_indices = @transform_11, window_bounds = array<i64: 1, 128, 32>}, {transform_indices = @transform_12, window_bounds = array<i64: 1, 1, 32>}, {transform_indices = @transform_13, window_bounds = array<i64: 1, 4, 32>}]} {
    %c0_i32 = arith.constant 0 : i32
    %0 = arith.cmpi eq, %arg1, %c0_i32 : i32
    %1 = arith.extui %0 : i1 to i32
    %c0_i32_0 = arith.constant 0 : i32
    %2 = arith.cmpi ne, %1, %c0_i32_0 : i32
    scf.if %2 {
      %c0_82 = arith.constant 0 : index
      %c0_83 = arith.constant 0 : index
      %c0_84 = arith.constant 0 : index
      %187 = vector.load %arg2[%c0_82, %c0_83, %c0_84] : memref<1x4x32xf32, #tpu.memory_space<vmem>>, vector<1x4x32xf32>
      %c0_85 = arith.constant 0 : index
      %c0_86 = arith.constant 0 : index
      %c0_87 = arith.constant 0 : index
      %188 = vector.load %arg15[%c0_85, %c0_86, %c0_87] : memref<1x4x32xf32, #tpu.memory_space<vmem>>, vector<1x4x32xf32>
      tpu.vector_store %arg15[%c0_85, %c0_86, %c0_87], %187 {strides = array<i32>} : memref<1x4x32xf32, #tpu.memory_space<vmem>>, vector<1x4x32xf32>,
    } else {
    }
    %c0 = arith.constant 0 : index
    %c0_1 = arith.constant 0 : index
    %c0_2 = arith.constant 0 : index
    %3 = vector.load %arg15[%c0, %c0_1, %c0_2] : memref<1x4x32xf32, #tpu.memory_space<vmem>>, vector<1x4x32xf32>
    %4 = vector.shape_cast %3 : vector<1x4x32xf32> to vector<4x32xf32>
    %c0_3 = arith.constant 0 : index
    %c0_4 = arith.constant 0 : index
    %c0_5 = arith.constant 0 : index
    %5 = vector.load %arg3[%c0_3, %c0_4, %c0_5] : memref<1x1x32xf32, #tpu.memory_space<vmem>>, vector<1x1x32xf32>
    %6 = vector.shape_cast %5 : vector<1x1x32xf32> to vector<1x32xf32>
    %c0_6 = arith.constant 0 : index
    %c0_7 = arith.constant 0 : index
    %c0_8 = arith.constant 0 : index
    %7 = vector.load %arg4[%c0_6, %c0_7, %c0_8] : memref<1x1x32xf32, #tpu.memory_space<vmem>>, vector<1x1x32xf32>
    %8 = vector.shape_cast %7 : vector<1x1x32xf32> to vector<1x32xf32>
    %cst = arith.constant dense<0.000000e+00> : vector<4xf32>
    %9 = vector.multi_reduction <add>, %4, %cst [1] : vector<4x32xf32> to vector<4xf32>
    %10 = vector.shape_cast %9 : vector<4xf32> to vector<4x1xf32>
    %cst_9 = arith.constant 3.200000e+01 : f32
    %11 = vector.broadcast %cst_9 : f32 to vector<4x1xf32>
    %12 = arith.divf %10, %11 : vector<4x1xf32>
    %13 = vector.broadcast %12 : vector<4x1xf32> to vector<4x32xf32>
    %14 = arith.subf %4, %13 : vector<4x32xf32>
    %15 = arith.mulf %14, %14 : vector<4x32xf32>
    %cst_10 = arith.constant dense<0.000000e+00> : vector<4xf32>
    %16 = vector.multi_reduction <add>, %15, %cst_10 [1] : vector<4x32xf32> to vector<4xf32>
    %17 = vector.shape_cast %16 : vector<4xf32> to vector<4x1xf32>
    %cst_11 = arith.constant 3.200000e+01 : f32
    %18 = vector.broadcast %cst_11 : f32 to vector<4x1xf32>
    %19 = arith.divf %17, %18 : vector<4x1xf32>
    %cst_12 = arith.constant 9.99999997E-7 : f32
    %20 = vector.broadcast %cst_12 : f32 to vector<4x1xf32>
    %21 = arith.addf %19, %20 : vector<4x1xf32>
    %22 = math.rsqrt %21 : vector<4x1xf32>
    %23 = vector.broadcast %22 : vector<4x1xf32> to vector<4x32xf32>
    %24 = arith.mulf %14, %23 : vector<4x32xf32>
    %25 = vector.broadcast %6 : vector<1x32xf32> to vector<4x32xf32>
    %26 = arith.mulf %24, %25 : vector<4x32xf32>
    %27 = vector.broadcast %8 : vector<1x32xf32> to vector<4x32xf32>
    %28 = arith.addf %26, %27 : vector<4x32xf32>
    %29 = arith.truncf %28 : vector<4x32xf32> to vector<4x32xbf16>
    %c0_13 = arith.constant 0 : index
    %c0_14 = arith.constant 0 : index
    %c0_15 = arith.constant 0 : index
    %30 = vector.load %arg5[%c0_13, %c0_14, %c0_15] : memref<1x32x96xbf16, #tpu.memory_space<vmem>>, vector<1x32x96xbf16>
    %31 = vector.shape_cast %30 : vector<1x32x96xbf16> to vector<32x96xbf16>
    %cst_16 = arith.constant dense<0.000000e+00> : vector<4x96xf32>
    %32 = tpu.matmul %29, %31, %cst_16 {dimension_numbers = #tpu.dot_dimension_numbers<[1], [0], [0], [1], [0, 0, 1, 1], [], []>} : vector<4x32xbf16>, vector<32x96xbf16>, vector<4x96xf32> -> vector<4x96xf32>
    %c0_17 = arith.constant 0 : index
    %c0_18 = arith.constant 0 : index
    %c0_19 = arith.constant 0 : index
    %33 = vector.load %arg6[%c0_17, %c0_18, %c0_19] : memref<1x1x96xf32, #tpu.memory_space<vmem>>, vector<1x1x96xf32>
    %34 = vector.shape_cast %33 : vector<1x1x96xf32> to vector<1x96xf32>
    %35 = vector.broadcast %34 : vector<1x96xf32> to vector<4x96xf32>
    %36 = arith.addf %32, %35 : vector<4x96xf32>
    %37 = vector.extract_strided_slice %36 {offsets = [0, 0], sizes = [4, 32], strides = [1, 1]} : vector<4x96xf32> to vector<4x32xf32>
    %38 = vector.extract_strided_slice %36 {offsets = [0, 32], sizes = [4, 32], strides = [1, 1]} : vector<4x96xf32> to vector<4x32xf32>
    %39 = vector.extract_strided_slice %36 {offsets = [0, 64], sizes = [4, 32], strides = [1, 1]} : vector<4x96xf32> to vector<4x32xf32>
    %40 = vector.extract_strided_slice %37 {offsets = [0, 0], sizes = [4, 8], strides = [1, 1]} : vector<4x32xf32> to vector<4x8xf32>
    %41 = arith.truncf %40 : vector<4x8xf32> to vector<4x8xbf16>
    %42 = vector.extract_strided_slice %38 {offsets = [0, 0], sizes = [4, 8], strides = [1, 1]} : vector<4x32xf32> to vector<4x8xf32>
    %43 = arith.truncf %42 : vector<4x8xf32> to vector<4x8xbf16>
    %44 = vector.extract_strided_slice %39 {offsets = [0, 0], sizes = [4, 8], strides = [1, 1]} : vector<4x32xf32> to vector<4x8xf32>
    %45 = arith.truncf %44 : vector<4x8xf32> to vector<4x8xbf16>
    %cst_20 = arith.constant dense<0.000000e+00> : vector<4x4xf32>
    %46 = tpu.matmul %41, %43, %cst_20 {dimension_numbers = #tpu.dot_dimension_numbers<[1], [1], [0], [0], [0, 0, 1, 0], [], []>} : vector<4x8xbf16>, vector<4x8xbf16>, vector<4x4xf32> -> vector<4x4xf32>
    %cst_21 = arith.constant dense<0xFF800000> : vector<4xf32>
    %47 = vector.multi_reduction <maximumf>, %46, %cst_21 [1] : vector<4x4xf32> to vector<4xf32>
    %48 = vector.shape_cast %47 : vector<4xf32> to vector<4x1xf32>
    %49 = vector.broadcast %48 : vector<4x1xf32> to vector<4x4xf32>
    %50 = arith.subf %46, %49 : vector<4x4xf32>
    %51 = math.exp %50 : vector<4x4xf32>
    %cst_22 = arith.constant dense<0.000000e+00> : vector<4xf32>
    %52 = vector.multi_reduction <add>, %51, %cst_22 [1] : vector<4x4xf32> to vector<4xf32>
    %53 = vector.shape_cast %52 : vector<4xf32> to vector<4x1xf32>
    %54 = tpu.reciprocal %53 {approx = true} : vector<4x1xf32> -> vector<4x1xf32>
    %55 = vector.broadcast %54 : vector<4x1xf32> to vector<4x4xf32>
    %56 = arith.mulf %51, %55 : vector<4x4xf32>
    %57 = arith.truncf %56 : vector<4x4xf32> to vector<4x4xbf16>
    %cst_23 = arith.constant dense<0.000000e+00> : vector<4x8xf32>
    %58 = tpu.matmul %57, %45, %cst_23 {dimension_numbers = #tpu.dot_dimension_numbers<[1], [0], [0], [1], [0, 0, 1, 1], [], []>} : vector<4x4xbf16>, vector<4x8xbf16>, vector<4x8xf32> -> vector<4x8xf32>
    %c0_24 = arith.constant 0 : index
    %c0_25 = arith.constant 0 : index
    %59 = vector.load %arg16[%c0_24, %c0_25] : memref<4x32xf32, #tpu.memory_space<vmem>>, vector<4x8xf32>
    tpu.vector_store %arg16[%c0_24, %c0_25], %58 {strides = array<i32>} : memref<4x32xf32, #tpu.memory_space<vmem>>, vector<4x8xf32>,
    %60 = vector.extract_strided_slice %37 {offsets = [0, 8], sizes = [4, 8], strides = [1, 1]} : vector<4x32xf32> to vector<4x8xf32>
    %61 = arith.truncf %60 : vector<4x8xf32> to vector<4x8xbf16>
    %62 = vector.extract_strided_slice %38 {offsets = [0, 8], sizes = [4, 8], strides = [1, 1]} : vector<4x32xf32> to vector<4x8xf32>
    %63 = arith.truncf %62 : vector<4x8xf32> to vector<4x8xbf16>
    %64 = vector.extract_strided_slice %39 {offsets = [0, 8], sizes = [4, 8], strides = [1, 1]} : vector<4x32xf32> to vector<4x8xf32>
    %65 = arith.truncf %64 : vector<4x8xf32> to vector<4x8xbf16>
    %cst_26 = arith.constant dense<0.000000e+00> : vector<4x4xf32>
    %66 = tpu.matmul %61, %63, %cst_26 {dimension_numbers = #tpu.dot_dimension_numbers<[1], [1], [0], [0], [0, 0, 1, 0], [], []>} : vector<4x8xbf16>, vector<4x8xbf16>, vector<4x4xf32> -> vector<4x4xf32>
    %cst_27 = arith.constant dense<0xFF800000> : vector<4xf32>
    %67 = vector.multi_reduction <maximumf>, %66, %cst_27 [1] : vector<4x4xf32> to vector<4xf32>
    %68 = vector.shape_cast %67 : vector<4xf32> to vector<4x1xf32>
    %69 = vector.broadcast %68 : vector<4x1xf32> to vector<4x4xf32>
    %70 = arith.subf %66, %69 : vector<4x4xf32>
    %71 = math.exp %70 : vector<4x4xf32>
    %cst_28 = arith.constant dense<0.000000e+00> : vector<4xf32>
    %72 = vector.multi_reduction <add>, %71, %cst_28 [1] : vector<4x4xf32> to vector<4xf32>
    %73 = vector.shape_cast %72 : vector<4xf32> to vector<4x1xf32>
    %74 = tpu.reciprocal %73 {approx = true} : vector<4x1xf32> -> vector<4x1xf32>
    %75 = vector.broadcast %74 : vector<4x1xf32> to vector<4x4xf32>
    %76 = arith.mulf %71, %75 : vector<4x4xf32>
    %77 = arith.truncf %76 : vector<4x4xf32> to vector<4x4xbf16>
    %cst_29 = arith.constant dense<0.000000e+00> : vector<4x8xf32>
    %78 = tpu.matmul %77, %65, %cst_29 {dimension_numbers = #tpu.dot_dimension_numbers<[1], [0], [0], [1], [0, 0, 1, 1], [], []>} : vector<4x4xbf16>, vector<4x8xbf16>, vector<4x8xf32> -> vector<4x8xf32>
    %c0_30 = arith.constant 0 : index
    %c8 = arith.constant 8 : index
    %79 = vector.load %arg16[%c0_30, %c8] : memref<4x32xf32, #tpu.memory_space<vmem>>, vector<4x8xf32>
    tpu.vector_store %arg16[%c0_30, %c8], %78 {strides = array<i32>} : memref<4x32xf32, #tpu.memory_space<vmem>>, vector<4x8xf32>,
    %80 = vector.extract_strided_slice %37 {offsets = [0, 16], sizes = [4, 8], strides = [1, 1]} : vector<4x32xf32> to vector<4x8xf32>
    %81 = arith.truncf %80 : vector<4x8xf32> to vector<4x8xbf16>
    %82 = vector.extract_strided_slice %38 {offsets = [0, 16], sizes = [4, 8], strides = [1, 1]} : vector<4x32xf32> to vector<4x8xf32>
    %83 = arith.truncf %82 : vector<4x8xf32> to vector<4x8xbf16>
    %84 = vector.extract_strided_slice %39 {offsets = [0, 16], sizes = [4, 8], strides = [1, 1]} : vector<4x32xf32> to vector<4x8xf32>
    %85 = arith.truncf %84 : vector<4x8xf32> to vector<4x8xbf16>
    %cst_31 = arith.constant dense<0.000000e+00> : vector<4x4xf32>
    %86 = tpu.matmul %81, %83, %cst_31 {dimension_numbers = #tpu.dot_dimension_numbers<[1], [1], [0], [0], [0, 0, 1, 0], [], []>} : vector<4x8xbf16>, vector<4x8xbf16>, vector<4x4xf32> -> vector<4x4xf32>
    %cst_32 = arith.constant dense<0xFF800000> : vector<4xf32>
    %87 = vector.multi_reduction <maximumf>, %86, %cst_32 [1] : vector<4x4xf32> to vector<4xf32>
    %88 = vector.shape_cast %87 : vector<4xf32> to vector<4x1xf32>
    %89 = vector.broadcast %88 : vector<4x1xf32> to vector<4x4xf32>
    %90 = arith.subf %86, %89 : vector<4x4xf32>
    %91 = math.exp %90 : vector<4x4xf32>
    %cst_33 = arith.constant dense<0.000000e+00> : vector<4xf32>
    %92 = vector.multi_reduction <add>, %91, %cst_33 [1] : vector<4x4xf32> to vector<4xf32>
    %93 = vector.shape_cast %92 : vector<4xf32> to vector<4x1xf32>
    %94 = tpu.reciprocal %93 {approx = true} : vector<4x1xf32> -> vector<4x1xf32>
    %95 = vector.broadcast %94 : vector<4x1xf32> to vector<4x4xf32>
    %96 = arith.mulf %91, %95 : vector<4x4xf32>
    %97 = arith.truncf %96 : vector<4x4xf32> to vector<4x4xbf16>
    %cst_34 = arith.constant dense<0.000000e+00> : vector<4x8xf32>
    %98 = tpu.matmul %97, %85, %cst_34 {dimension_numbers = #tpu.dot_dimension_numbers<[1], [0], [0], [1], [0, 0, 1, 1], [], []>} : vector<4x4xbf16>, vector<4x8xbf16>, vector<4x8xf32> -> vector<4x8xf32>
    %c0_35 = arith.constant 0 : index
    %c16 = arith.constant 16 : index
    %99 = vector.load %arg16[%c0_35, %c16] : memref<4x32xf32, #tpu.memory_space<vmem>>, vector<4x8xf32>
    tpu.vector_store %arg16[%c0_35, %c16], %98 {strides = array<i32>} : memref<4x32xf32, #tpu.memory_space<vmem>>, vector<4x8xf32>,
    %100 = vector.extract_strided_slice %37 {offsets = [0, 24], sizes = [4, 8], strides = [1, 1]} : vector<4x32xf32> to vector<4x8xf32>
    %101 = arith.truncf %100 : vector<4x8xf32> to vector<4x8xbf16>
    %102 = vector.extract_strided_slice %38 {offsets = [0, 24], sizes = [4, 8], strides = [1, 1]} : vector<4x32xf32> to vector<4x8xf32>
    %103 = arith.truncf %102 : vector<4x8xf32> to vector<4x8xbf16>
    %104 = vector.extract_strided_slice %39 {offsets = [0, 24], sizes = [4, 8], strides = [1, 1]} : vector<4x32xf32> to vector<4x8xf32>
    %105 = arith.truncf %104 : vector<4x8xf32> to vector<4x8xbf16>
    %cst_36 = arith.constant dense<0.000000e+00> : vector<4x4xf32>
    %106 = tpu.matmul %101, %103, %cst_36 {dimension_numbers = #tpu.dot_dimension_numbers<[1], [1], [0], [0], [0, 0, 1, 0], [], []>} : vector<4x8xbf16>, vector<4x8xbf16>, vector<4x4xf32> -> vector<4x4xf32>
    %cst_37 = arith.constant dense<0xFF800000> : vector<4xf32>
    %107 = vector.multi_reduction <maximumf>, %106, %cst_37 [1] : vector<4x4xf32> to vector<4xf32>
    %108 = vector.shape_cast %107 : vector<4xf32> to vector<4x1xf32>
    %109 = vector.broadcast %108 : vector<4x1xf32> to vector<4x4xf32>
    %110 = arith.subf %106, %109 : vector<4x4xf32>
    %111 = math.exp %110 : vector<4x4xf32>
    %cst_38 = arith.constant dense<0.000000e+00> : vector<4xf32>
    %112 = vector.multi_reduction <add>, %111, %cst_38 [1] : vector<4x4xf32> to vector<4xf32>
    %113 = vector.shape_cast %112 : vector<4xf32> to vector<4x1xf32>
    %114 = tpu.reciprocal %113 {approx = true} : vector<4x1xf32> -> vector<4x1xf32>
    %115 = vector.broadcast %114 : vector<4x1xf32> to vector<4x4xf32>
    %116 = arith.mulf %111, %115 : vector<4x4xf32>
    %117 = arith.truncf %116 : vector<4x4xf32> to vector<4x4xbf16>
    %cst_39 = arith.constant dense<0.000000e+00> : vector<4x8xf32>
    %118 = tpu.matmul %117, %105, %cst_39 {dimension_numbers = #tpu.dot_dimension_numbers<[1], [0], [0], [1], [0, 0, 1, 1], [], []>} : vector<4x4xbf16>, vector<4x8xbf16>, vector<4x8xf32> -> vector<4x8xf32>
    %c0_40 = arith.constant 0 : index
    %c24 = arith.constant 24 : index
    %119 = vector.load %arg16[%c0_40, %c24] : memref<4x32xf32, #tpu.memory_space<vmem>>, vector<4x8xf32>
    tpu.vector_store %arg16[%c0_40, %c24], %118 {strides = array<i32>} : memref<4x32xf32, #tpu.memory_space<vmem>>, vector<4x8xf32>,
    %c0_41 = arith.constant 0 : index
    %c0_42 = arith.constant 0 : index
    %120 = vector.load %arg16[%c0_41, %c0_42] : memref<4x32xf32, #tpu.memory_space<vmem>>, vector<4x32xf32>
    %121 = arith.truncf %120 : vector<4x32xf32> to vector<4x32xbf16>
    %c0_43 = arith.constant 0 : index
    %c0_44 = arith.constant 0 : index
    %c0_45 = arith.constant 0 : index
    %122 = vector.load %arg7[%c0_43, %c0_44, %c0_45] : memref<1x32x32xbf16, #tpu.memory_space<vmem>>, vector<1x32x32xbf16>
    %123 = vector.shape_cast %122 : vector<1x32x32xbf16> to vector<32x32xbf16>
    %cst_46 = arith.constant dense<0.000000e+00> : vector<4x32xf32>
    %124 = tpu.matmul %121, %123, %cst_46 {dimension_numbers = #tpu.dot_dimension_numbers<[1], [0], [0], [1], [0, 0, 1, 1], [], []>} : vector<4x32xbf16>, vector<32x32xbf16>, vector<4x32xf32> -> vector<4x32xf32>
    %c0_47 = arith.constant 0 : index
    %c0_48 = arith.constant 0 : index
    %c0_49 = arith.constant 0 : index
    %125 = vector.load %arg8[%c0_47, %c0_48, %c0_49] : memref<1x1x32xf32, #tpu.memory_space<vmem>>, vector<1x1x32xf32>
    %126 = vector.shape_cast %125 : vector<1x1x32xf32> to vector<1x32xf32>
    %127 = vector.broadcast %126 : vector<1x32xf32> to vector<4x32xf32>
    %128 = arith.addf %124, %127 : vector<4x32xf32>
    %129 = arith.addf %4, %128 : vector<4x32xf32>
    %c0_50 = arith.constant 0 : index
    %c0_51 = arith.constant 0 : index
    %c0_52 = arith.constant 0 : index
    %130 = vector.load %arg9[%c0_50, %c0_51, %c0_52] : memref<1x1x32xf32, #tpu.memory_space<vmem>>, vector<1x1x32xf32>
    %131 = vector.shape_cast %130 : vector<1x1x32xf32> to vector<1x32xf32>
    %c0_53 = arith.constant 0 : index
    %c0_54 = arith.constant 0 : index
    %c0_55 = arith.constant 0 : index
    %132 = vector.load %arg10[%c0_53, %c0_54, %c0_55] : memref<1x1x32xf32, #tpu.memory_space<vmem>>, vector<1x1x32xf32>
    %133 = vector.shape_cast %132 : vector<1x1x32xf32> to vector<1x32xf32>
    %cst_56 = arith.constant dense<0.000000e+00> : vector<4xf32>
    %134 = vector.multi_reduction <add>, %129, %cst_56 [1] : vector<4x32xf32> to vector<4xf32>
    %135 = vector.shape_cast %134 : vector<4xf32> to vector<4x1xf32>
    %cst_57 = arith.constant 3.200000e+01 : f32
    %136 = vector.broadcast %cst_57 : f32 to vector<4x1xf32>
    %137 = arith.divf %135, %136 : vector<4x1xf32>
    %138 = vector.broadcast %137 : vector<4x1xf32> to vector<4x32xf32>
    %139 = arith.subf %129, %138 : vector<4x32xf32>
    %140 = arith.mulf %139, %139 : vector<4x32xf32>
    %cst_58 = arith.constant dense<0.000000e+00> : vector<4xf32>
    %141 = vector.multi_reduction <add>, %140, %cst_58 [1] : vector<4x32xf32> to vector<4xf32>
    %142 = vector.shape_cast %141 : vector<4xf32> to vector<4x1xf32>
    %cst_59 = arith.constant 3.200000e+01 : f32
    %143 = vector.broadcast %cst_59 : f32 to vector<4x1xf32>
    %144 = arith.divf %142, %143 : vector<4x1xf32>
    %cst_60 = arith.constant 9.99999997E-7 : f32
    %145 = vector.broadcast %cst_60 : f32 to vector<4x1xf32>
    %146 = arith.addf %144, %145 : vector<4x1xf32>
    %147 = math.rsqrt %146 : vector<4x1xf32>
    %148 = vector.broadcast %147 : vector<4x1xf32> to vector<4x32xf32>
    %149 = arith.mulf %139, %148 : vector<4x32xf32>
    %150 = vector.broadcast %131 : vector<1x32xf32> to vector<4x32xf32>
    %151 = arith.mulf %149, %150 : vector<4x32xf32>
    %152 = vector.broadcast %133 : vector<1x32xf32> to vector<4x32xf32>
    %153 = arith.addf %151, %152 : vector<4x32xf32>
    %154 = arith.truncf %153 : vector<4x32xf32> to vector<4x32xbf16>
    %c0_61 = arith.constant 0 : index
    %c0_62 = arith.constant 0 : index
    %c0_63 = arith.constant 0 : index
    %155 = vector.load %arg11[%c0_61, %c0_62, %c0_63] : memref<1x32x128xbf16, #tpu.memory_space<vmem>>, vector<1x32x128xbf16>
    %156 = vector.shape_cast %155 : vector<1x32x128xbf16> to vector<32x128xbf16>
    %cst_64 = arith.constant dense<0.000000e+00> : vector<4x128xf32>
    %157 = tpu.matmul %154, %156, %cst_64 {dimension_numbers = #tpu.dot_dimension_numbers<[1], [0], [0], [1], [0, 0, 1, 1], [], []>} : vector<4x32xbf16>, vector<32x128xbf16>, vector<4x128xf32> -> vector<4x128xf32>
    %c0_65 = arith.constant 0 : index
    %c0_66 = arith.constant 0 : index
    %c0_67 = arith.constant 0 : index
    %158 = vector.load %arg12[%c0_65, %c0_66, %c0_67] : memref<1x1x128xf32, #tpu.memory_space<vmem>>, vector<1x1x128xf32>
    %159 = vector.shape_cast %158 : vector<1x1x128xf32> to vector<1x128xf32>
    %160 = vector.broadcast %159 : vector<1x128xf32> to vector<4x128xf32>
    %161 = arith.addf %157, %160 : vector<4x128xf32>
    %cst_68 = arith.constant 5.000000e-01 : f32
    %162 = vector.broadcast %cst_68 : f32 to vector<4x128xf32>
    %163 = arith.mulf %162, %161 : vector<4x128xf32>
    %cst_69 = arith.constant 4.471500e-02 : f32
    %164 = vector.broadcast %cst_69 : f32 to vector<4x128xf32>
    %165 = arith.mulf %164, %161 : vector<4x128xf32>
    %166 = arith.mulf %165, %161 : vector<4x128xf32>
    %167 = arith.mulf %166, %161 : vector<4x128xf32>
    %168 = arith.addf %161, %167 : vector<4x128xf32>
    %cst_70 = arith.constant 0.797884583 : f32
    %169 = vector.broadcast %cst_70 : f32 to vector<4x128xf32>
    %170 = arith.mulf %169, %168 : vector<4x128xf32>
    %171 = math.tanh %170 : vector<4x128xf32>
    %cst_71 = arith.constant 1.000000e+00 : f32
    %172 = vector.broadcast %cst_71 : f32 to vector<4x128xf32>
    %173 = arith.addf %172, %171 : vector<4x128xf32>
    %174 = arith.mulf %163, %173 : vector<4x128xf32>
    %175 = arith.truncf %174 : vector<4x128xf32> to vector<4x128xbf16>
    %c0_72 = arith.constant 0 : index
    %c0_73 = arith.constant 0 : index
    %c0_74 = arith.constant 0 : index
    %176 = vector.load %arg13[%c0_72, %c0_73, %c0_74] : memref<1x128x32xbf16, #tpu.memory_space<vmem>>, vector<1x128x32xbf16>
    %177 = vector.shape_cast %176 : vector<1x128x32xbf16> to vector<128x32xbf16>
    %cst_75 = arith.constant dense<0.000000e+00> : vector<4x32xf32>
    %178 = tpu.matmul %175, %177, %cst_75 {dimension_numbers = #tpu.dot_dimension_numbers<[1], [0], [0], [1], [0, 0, 1, 1], [], []>} : vector<4x128xbf16>, vector<128x32xbf16>, vector<4x32xf32> -> vector<4x32xf32>
    %c0_76 = arith.constant 0 : index
    %c0_77 = arith.constant 0 : index
    %c0_78 = arith.constant 0 : index
    %179 = vector.load %arg14[%c0_76, %c0_77, %c0_78] : memref<1x1x32xf32, #tpu.memory_space<vmem>>, vector<1x1x32xf32>
    %180 = vector.shape_cast %179 : vector<1x1x32xf32> to vector<1x32xf32>
    %181 = vector.broadcast %180 : vector<1x32xf32> to vector<4x32xf32>
    %182 = arith.addf %178, %181 : vector<4x32xf32>
    %183 = arith.addf %129, %182 : vector<4x32xf32>
    %c0_79 = arith.constant 0 : index
    %c0_80 = arith.constant 0 : index
    %c0_81 = arith.constant 0 : index
    %184 = vector.load %arg15[%c0_79, %c0_80, %c0_81] : memref<1x4x32xf32, #tpu.memory_space<vmem>>, vector<1x4x32xf32>
    %185 = vector.shape_cast %184 : vector<1x4x32xf32> to vector<4x32xf32>
    %186 = vector.shape_cast %183 : vector<4x32xf32> to vector<1x4x32xf32>
    tpu.vector_store %arg15[%c0_79, %c0_80, %c0_81], %186 {strides = array<i32>} : memref<1x4x32xf32, #tpu.memory_space<vmem>>, vector<1x4x32xf32>,
    return
  }
  func.func @transform_0(%arg0: i32, %arg1: i32) -> (i32, i32, i32) {
    %c0_i32 = arith.constant 0 : i32
    %c0_i32_0 = arith.constant 0 : i32
    %c0_i32_1 = arith.constant 0 : i32
    return %arg0, %c0_i32, %c0_i32_0 : i32, i32, i32
  }
  func.func @transform_1(%arg0: i32, %arg1: i32) -> (i32, i32, i32) {
    %c0_i32 = arith.constant 0 : i32
    %c0_i32_0 = arith.constant 0 : i32
    %c0_i32_1 = arith.constant 0 : i32
    return %arg1, %c0_i32, %c0_i32_0 : i32, i32, i32
  }
  func.func @transform_2(%arg0: i32, %arg1: i32) -> (i32, i32, i32) {
    %c0_i32 = arith.constant 0 : i32
    %c0_i32_0 = arith.constant 0 : i32
    %c0_i32_1 = arith.constant 0 : i32
    return %arg1, %c0_i32, %c0_i32_0 : i32, i32, i32
  }
  func.func @transform_3(%arg0: i32, %arg1: i32) -> (i32, i32, i32) {
    %c0_i32 = arith.constant 0 : i32
    %c0_i32_0 = arith.constant 0 : i32
    %c0_i32_1 = arith.constant 0 : i32
    return %arg1, %c0_i32, %c0_i32_0 : i32, i32, i32
  }
  func.func @transform_4(%arg0: i32, %arg1: i32) -> (i32, i32, i32) {
    %c0_i32 = arith.constant 0 : i32
    %c0_i32_0 = arith.constant 0 : i32
    %c0_i32_1 = arith.constant 0 : i32
    return %arg1, %c0_i32, %c0_i32_0 : i32, i32, i32
  }
  func.func @transform_5(%arg0: i32, %arg1: i32) -> (i32, i32, i32) {
    %c0_i32 = arith.constant 0 : i32
    %c0_i32_0 = arith.constant 0 : i32
    %c0_i32_1 = arith.constant 0 : i32
    return %arg1, %c0_i32, %c0_i32_0 : i32, i32, i32
  }
  func.func @transform_6(%arg0: i32, %arg1: i32) -> (i32, i32, i32) {
    %c0_i32 = arith.constant 0 : i32
    %c0_i32_0 = arith.constant 0 : i32
    %c0_i32_1 = arith.constant 0 : i32
    return %arg1, %c0_i32, %c0_i32_0 : i32, i32, i32
  }
  func.func @transform_7(%arg0: i32, %arg1: i32) -> (i32, i32, i32) {
    %c0_i32 = arith.constant 0 : i32
    %c0_i32_0 = arith.constant 0 : i32
    %c0_i32_1 = arith.constant 0 : i32
    return %arg1, %c0_i32, %c0_i32_0 : i32, i32, i32
  }
  func.func @transform_8(%arg0: i32, %arg1: i32) -> (i32, i32, i32) {
    %c0_i32 = arith.constant 0 : i32
    %c0_i32_0 = arith.constant 0 : i32
    %c0_i32_1 = arith.constant 0 : i32
    return %arg1, %c0_i32, %c0_i32_0 : i32, i32, i32
  }
  func.func @transform_9(%arg0: i32, %arg1: i32) -> (i32, i32, i32) {
    %c0_i32 = arith.constant 0 : i32
    %c0_i32_0 = arith.constant 0 : i32
    %c0_i32_1 = arith.constant 0 : i32
    return %arg1, %c0_i32, %c0_i32_0 : i32, i32, i32
  }
  func.func @transform_10(%arg0: i32, %arg1: i32) -> (i32, i32, i32) {
    %c0_i32 = arith.constant 0 : i32
    %c0_i32_0 = arith.constant 0 : i32
    %c0_i32_1 = arith.constant 0 : i32
    return %arg1, %c0_i32, %c0_i32_0 : i32, i32, i32
  }
  func.func @transform_11(%arg0: i32, %arg1: i32) -> (i32, i32, i32) {
    %c0_i32 = arith.constant 0 : i32
    %c0_i32_0 = arith.constant 0 : i32
    %c0_i32_1 = arith.constant 0 : i32
    return %arg1, %c0_i32, %c0_i32_0 : i32, i32, i32
  }
  func.func @transform_12(%arg0: i32, %arg1: i32) -> (i32, i32, i32) {
    %c0_i32 = arith.constant 0 : i32
    %c0_i32_0 = arith.constant 0 : i32
    %c0_i32_1 = arith.constant 0 : i32
    return %arg1, %c0_i32, %c0_i32_0 : i32, i32, i32
  }
  func.func @transform_13(%arg0: i32, %arg1: i32) -> (i32, i32, i32) {
    %c0_i32 = arith.constant 0 : i32
    %c0_i32_0 = arith.constant 0 : i32
    %c0_i32_1 = arith.constant 0 : i32
    return %arg0, %c0_i32, %c0_i32_0 : i32, i32, i32
  }
}

</mosaic_0001>

<bundles_post_ra>
// kernel: tpu_custom_call.1
= control target key start
LH: loop header
LB: loop body
LE: loop exit
PB: predicated region body
PF: predicated region fallthrough
CT: control target
= control target key end

     0   :  { %s1884_s0 = inlined_call_operand.vmem [shape: f32[1,4,32], index: 0, kind: input, shape index: {}]   ;;  %s1885_s1 = inlined_call_operand.vmem [shape: f32[2,1,32], index: 1, kind: input, shape index: {}]   ;;  %s1886_s2 = inlined_call_operand.vmem [shape: f32[2,1,32], index: 2, kind: input, shape index: {}]   ;;  %s1887_s3 = inlined_call_operand.vmem [shape: bf16[2,32,96], index: 3, kind: input, shape index: {}]   ;;  %s1888_s4 = inlined_call_operand.vmem [shape: f32[2,1,96], index: 4, kind: input, shape index: {}]   ;;  %s1889_s5 = inlined_call_operand.vmem [shape: bf16[2,32,32], index: 5, kind: input, shape index: {}]   ;;  %s1890_s6 = inlined_call_operand.vmem [shape: f32[2,1,32], index: 6, kind: input, shape index: {}]   ;;  %s1891_s7 = inlined_call_operand.vmem [shape: f32[2,1,32], index: 7, kind: input, shape index: {}]   ;;  %s1892_s8 = inlined_call_operand.vmem [shape: f32[2,1,32], index: 8, kind: input, shape index: {}]   ;;  %s1893_s9 = inlined_call_operand.vmem [shape: bf16[2,32,128], index: 9, kind: input, shape index: {}]   ;;  %s1894_s10 = inlined_call_operand.vmem [shape: f32[2,1,128], index: 10, kind: input, shape index: {}]   ;;  %s1895_s11 = inlined_call_operand.vmem [shape: bf16[2,128,32], index: 11, kind: input, shape index: {}]   ;;  %s1896_s12 = inlined_call_operand.vmem [shape: f32[2,1,32], index: 12, kind: input, shape index: {}]   ;;  %s1897_s13 = inlined_call_operand.hbm [shape: f32[1,4,32], index: 13, kind: output, shape index: {}]  }
   0x1   :  { %1901 = sst [smem:[#allocation10_spill]] %s1887_s3 }
   0x2   :  { %1902 = sst [smem:[#allocation11_spill]] %s1889_s5 }
   0x3   :  { %1903 = sst [smem:[#allocation12_spill]] %s1897_s13 }
   0x4   :  { %18 = vsyncpa [#allocation4], 0  ;;  %s1676_s25 = smov 0   ;;  %s1678_s26 = smov 0  }
   0x5   :  { %s1680_s27 = smov 0  }
   0x6 LB: > { %1904 = sst [smem:[#allocation6_spill]] %s1584_s26  ;;  %s33_s29 = sadd.s32 1, %s1584_s26  ;;  %s1588_s27 = sphi %s1680_s27, %s24_s27   ;;  %s1584_s26 = sphi %s1678_s26, %s1920_s26   ;;  %s1580_s25 = sphi %s1676_s25, %s1919_s25  }
   0x7   : > { %1905 = sst [smem:[#allocation7_spill]] %s1588_s27  ;;  %p34_p0 = scmp.ge.s32.totalorder %s33_s29, 2 }
   0x8   : > { %p1357_p1 = scmp.ge.s32.totalorder %s1588_s27, 1  ;;  %p503_p2 = scmp.lt.s32.totalorder %s1588_s27, 3 }
   0x9   : > { %s1922_s29 = smov (%p34_p0, %s33_s29), 0 }
   0xa   : > { %1906 = sst [smem:[#allocation8_spill]] %s1922_s29  ;;  %p504_p3 = pnand %p1357_p1, %p503_p2 }
   0xc   : > { %507 = sbr.rel (%p504_p3) target bundleno = 2343 (0x927), region = 72 }
  0x11   : > { %p589_p4 = scmp.lt.s32.totalorder %s1580_s25, 1  ;;  %s1907_s3 = sld [smem:[#allocation10_spill]] }
  0x12   : > { %s1908_s5 = sld [smem:[#allocation11_spill]]  ;;  %p1366_p5 = scmp.ne.s32.totalorder %s1580_s25, 0 }
  0x13   : > { %s1695_s30 = scalar_select %p589_p4, %s1580_s25, 1 }
  0x15   : > { %s1438_s20 = sshll.u32 %s1695_s30, 4  ;;  %s613_s27 = scalar_lea.vmem %s1891_s7, %s1695_s30 }
  0x16   : > { %s616_s23 = scalar_lea.vmem %s1892_s8, %s1695_s30  ;;  %s632_s21 = scalar_lea.vmem %s1896_s12, %s1695_s30 }
  0x17   : > { %s1713_s15 = scalar_lea.vmem %s1907_s3, %s1438_s20  ;;  %s1735_s3 = scalar_lea.vmem %s1893_s9, %s1438_s20 }
  0x18   : > { %s1718_s26 = scalar_lea.vmem %s1908_s5, %s1438_s20  ;;  %s624_s5 = scalar_lea.vmem %s1894_s10, %s1695_s30 }
  0x19   : > { %1909 = sst [smem:[#allocation9_spill]] %s1718_s26  ;;  %s1441_s26 = sshll.u32 %s1695_s30, 6 }
  0x1a   : > { %s1745_s17 = scalar_lea.vmem %s1895_s11, %s1441_s26  ;;  %637 = sbr.rel (%p1366_p5) target bundleno = 33 (0x21), region = 76 }
  0x1f   : > { %v638_v0 = vld [vmem:[%s1884_s0] sm:$0xf]  ;;  %vm639_vm0 = vcmask 257024  }
  0x20   : > { %640 = vst.msk [vmem:[#allocation3] sm:$0xf] %vm639_vm0, %v638_v0 }
  0x21 PF: > { %vm644_vm1 = vcmask 257024   ;;  %v1590_v3 = vmov 32.0   ;;  %v1443_v15 = vld [vmem:[%s1713_s15 + $0x8] sm:$0xff]  ;;  %v1442_v16 = vld [vmem:[%s1713_s15] sm:$0xff]  ;;  %s1910_s20 = scalar_lea.vmem %s1885_s1, %s1695_s30  ;;  %s1911_s28 = scalar_lea.vmem %s1886_s2, %s1695_s30  ;;  %vm703_vm6 = vcmask 261120   ;;  %vm763_vm7 = vcmask 1041408  }
  0x22   : > { %1510 = vrcp.f32 %v1590_v3  ;;  %713 = vmatpush.bf16.msra.mxu0 %v1443_v15  ;;  %v1502_v26 = vld [vmem:[%s1910_s20] ss:$0 sm:$0xff]  ;;  %s1912_s16 = scalar_lea.vmem %s1888_s4, %s1695_s30  ;;  %s1591_s19 = smov 88   ;;  %vm724_vm8 = vcmask 64512   ;;  %vm744_vm9 = vcmask 27648   ;;  %vm759_vm10 = vcmask 31744  }
  0x23   : > { %v1503_v29 = vld [vmem:[%s1911_s28] ss:$0 sm:$0xff]  ;;  %s1592_s18 = smov 64   ;;  %s1593_s22 = smov 96   ;;  %vm780_vm11 = vcmask 60416   ;;  %vm842_vm12 = vcmask 126016  }
  0x24   : > { %v1504_v33 = vld [vmem:[%s1912_s16] ss:$0 sm:$0xff]  ;;  %s1594_s24 = smov 72   ;;  %s1595_s25 = smov 80   ;;  %vm904_vm13 = vcmask 191616   ;;  %vm966_vm14 = vcmask 257216  }
  0x25   : > { %s1596_s26 = smov 120   ;;  %s1597_s20 = smov 104  }
  0x26   : > { %714 = vmatpush.bf16.msra.mxu0 %v1442_v16  ;;  %s1598_s15 = smov 112   ;;  %s1599_s14 = smov 40  }
  0x27   : > { %v1754_v1 = vld [vmem:[#allocation3] sm:$0xf]  ;;  %s1600_s28 = smov 48   ;;  %s1601_s29 = smov 56  }
  0x28   : > { %v645_v2 = vsel %vm644_vm1, %v1754_v1, 0.0  ;;  %v1511_v4 = vpop.eup %1510  ;;  %s1913_s13 = sld [smem:[#allocation9_spill]]  ;;  %s1602_s16 = smov 16  }
  0x29   : > { %646 = vadd.xlane.f32.xlu0 %v645_v2  ;;  %v649_v5 = vmul.f32 32.0, %v1511_v4  ;;  %vm653_vm2 = vweird.f32 %v1511_v4 }
  0x2b   : > { %v650_v6 = vsub.f32 1.0, %v649_v5 }
  0x2d   : > { %v651_v7 = vmul.f32 %v1511_v4, %v650_v6 }
  0x2f   : > { %v652_v8 = vadd.f32 %v1511_v4, %v651_v7 }
  0x31   : > { %v1758_v9 = vsel %vm653_vm2, %v1511_v4, %v652_v8 }
  0x9c   : > { %v647_v10 = vpop.xlane.xlu0 %646 }
  0x9d   : > { %v655_v11 = vmul.f32 %v1758_v9, %v647_v10 }
  0x9f   : > { %v656_v12 = vsub.f32 %v1754_v1, %v655_v11 }
  0xa1   : > { %v657_v13 = vmul.f32 %v656_v12, %v656_v12 }
  0xa3   : > { %v658_v14 = vsel %vm644_vm1, %v657_v13, 0.0 }
  0xa4   : > { %659 = vadd.xlane.f32.xlu0 %v658_v14 }
 0x117   : > { %v660_v17 = vpop.xlane.xlu0 %659 }
 0x118   : > { %v661_v18 = vmul.f32 %v660_v17, %v1758_v9 }
 0x11a   : > { %v662_v19 = vadd.f32 1e-06, %v661_v18 }
 0x11c   : > { %1512 = vrsqrt.f32 %v662_v19  ;;  %vm669_vm4 = vweird.f32 %v662_v19 }
 0x122   : > { %v1513_v20 = vpop.eup %1512 }
 0x123   : > { %v664_v21 = vmul.f32 %v1513_v20, %v662_v19  ;;  %vm670_vm3 = vweird.f32 %v1513_v20 }
 0x124   : > { %vm671_vm5 = vmor %vm669_vm4, %vm670_vm3 }
 0x125   : > { %v665_v22 = vmul.f32 %v1513_v20, %v664_v21 }
 0x127   : > { %v666_v23 = vmul.f32 0.5, %v665_v22 }
 0x129   : > { %v667_v24 = vsub.f32 1.5, %v666_v23 }
 0x12b   : > { %v668_v25 = vmul.f32 %v1513_v20, %v667_v24 }
 0x12d   : > { %v672_v27 = vsel %vm671_vm5, %v1513_v20, %v668_v25 }
 0x12e   : > { %v673_v28 = vmul.f32 %v672_v27, %v656_v12 }
 0x130   : > { %v677_v30 = vmul.f32 %v1502_v26, %v673_v28 }
 0x132   : > { %v681_v31 = vadd.f32 %v1503_v29, %v677_v30 }
 0x134   : > { %v682_v32 = vpack.c.bf16 %v681_v31, %v681_v31 }
 0x136   : > { %1375 = vmatmul.msk.bf16.vlgmr.msra.gmra.mxu0 %vm703_vm6, %v682_v32 }
 0x1b3   : > { %v716_v34 = vpop.f32.mrf.mxu0 }
 0x1b4   : > { %v717_v35 = vadd.f32 %v1504_v33, %v716_v34 }
 0x1b6   : > { %v1782_v36 = vpack.c.bf16 %v717_v35, %v717_v35 }
 0x1b8   : > { %784 = vrot.lane.b32.xlu0 %v1782_v36, %s1591_s19  ;;  %757 = vrot.lane.b32.xlu2 %v1782_v36, %s1592_s18  ;;  %s1603_s19 = smov 8   ;;  %s1604_s18 = smov 24  }
 0x1b9   : > { %722 = vrot.lane.b32.xlu1 %v1782_v36, %s1593_s22 }
 0x1bb   : > { %v718_v37 = vpop.f32.mrf.mxu0 }
 0x1c0   : > { %908 = vrot.lane.b32.xlu0 %v1782_v36, %s1594_s24 }
 0x1c8   : > { %846 = vrot.lane.b32.xlu0 %v1782_v36, %s1595_s25  ;;  %s1914_s25 = scalar_lea.vmem %s1890_s6, %s1695_s30 }
 0x212   : > { %v758_v38 = vpop.permute.xlu2 %757 }
 0x213   : > { %v765_v39 = vsel %vm763_vm7, %v758_v38, 0 }
 0x214   : > { %774 = vmatpush.bf16.msra.mxu2 %v765_v39 }
 0x22a   : > { %v785_v40 = vpop.permute.xlu0 %784 }
 0x22b   : > { %v723_v41 = vpop.permute.xlu1 %722  ;;  %v790_v42 = vsel %vm724_vm8, %v785_v40, 0 }
 0x22c   : > { %v729_v43 = vsel %vm724_vm8, %v723_v41, 0  ;;  %799 = vmatpush.bf16.xpose.msrb.mxu2 %v790_v42 }
 0x22d   : > { %738 = vmatpush.bf16.xpose.msra.mxu1 %v729_v43 }
 0x232   : > { %v909_v44 = vpop.permute.xlu0 %908 }
 0x233   : > { %v914_v45 = vsel %vm724_vm8, %v909_v44, 0 }
 0x234   : > { %1376 = vmatmul.msk.bf16.vlgmr.msra.gmra.mxu1 %vm724_vm8, %v1782_v36  ;;  %923 = vmatpush.bf16.xpose.msra.mxu3 %v914_v45 }
 0x23a   : > { %v847_v46 = vpop.permute.xlu0 %846 }
 0x23b   : > { %v852_v47 = vsel %vm724_vm8, %v847_v46, 0 }
 0x23c   : > { %861 = vmatpush.bf16.xpose.msrb.mxu0 %v852_v47 }
 0x2b1   : > { %v740_v48 = vpop.f32.mrf.mxu1 }
 0x2b2   : > { %v745_v49 = vsel %vm744_vm9, %v740_v48, -inf }
 0x2b3   : > { %746 = vmax.xlane.f32.xlu1 %v745_v49 }
 0x2b9   : > { %v742_v50 = vpop.f32.mrf.mxu1 }
 0x326   : > { %v747_v51 = vpop.xlane.xlu1 %746 }
 0x327   : > { %v748_v52 = vsub.f32 %v740_v48, %v747_v51  ;;  %v1445_v51 = vld [vmem:[%s1913_s13 + $0x8] sm:$0xff] }
 0x328   : > { %999 = vmatpush.bf16.msra.mxu0 %v1445_v51 }
 0x329   : > { %v749_v53 = vmul.f32 1.442695, %v748_v52 }
 0x32b   : > { %1514 = vpow2.f32 %v749_v53 }
 0x331   : > { %v1515_v54 = vpop.eup %1514 }
 0x332   : > { %v751_v55 = vsel %vm744_vm9, %v1515_v54, 0.0 }
 0x333   : > { %752 = vadd.xlane.f32.xlu2 %v751_v55 }
 0x34b   : > { %782 = vrot.lane.b32.xlu2 %v1782_v36, %s1596_s26 }
 0x353   : > { %906 = vrot.lane.b32.xlu2 %v1782_v36, %s1597_s20 }
 0x35b   : > { %844 = vrot.lane.b32.xlu2 %v1782_v36, %s1598_s15 }
 0x3a6   : > { %v753_v56 = vpop.xlane.xlu2 %752 }
 0x3a7   : > { %1516 = vrcp.f32 %v753_v56 }
 0x3ad   : > { %v1517_v57 = vpop.eup %1516 }
 0x3ae   : > { %v783_v58 = vpop.permute.xlu2 %782  ;;  %v755_v59 = vmul.f32 %v1517_v57, %v1515_v54  ;;  %v1444_v54 = vld [vmem:[%s1913_s13] sm:$0xff] }
 0x3af   : > { %1000 = vmatpush.bf16.msra.mxu0 %v1444_v54 }
 0x3b0   : > { %v756_v60 = vpack.c.bf16 %v755_v59, %v755_v59 }
 0x3b2   : > { %1377 = vmatmul.msk.bf16.vlgmr.msra.gmra.mxu2 %vm759_vm10, %v756_v60 }
 0x3b6   : > { %v907_v61 = vpop.permute.xlu2 %906 }
 0x3b7   : > { %1382 = vmatmul.msk.bf16.vlgmr.msra.gmra.mxu3 %vm724_vm8, %v907_v61 }
 0x3be   : > { %v845_v62 = vpop.permute.xlu2 %844 }
 0x3bf   : > { %1380 = vmatmul.msk.bf16.vlgmr.msrb.gmra.mxu0 %vm724_vm8, %v845_v62 }
 0x3c2   : > { %1378 = vmatmul.msk.bf16.vlgmr.msrb.gmra.mxu2 %vm724_vm8, %v783_v58  ;;  %v1505_v58 = vld [vmem:[%s1914_s25] ss:$0 sm:$0xff] }
 0x435   : > { %v776_v63 = vpop.f32.mrf.mxu2 }
 0x436   : > { %781 = vst.msk [vmem:[#allocation2] sm:$0xf] %vm780_vm11, %v776_v63 }
 0x43a   : > { %v925_v0 = vpop.f32.mrf.mxu3 }
 0x43b   : > { %v929_v2 = vsel %vm744_vm9, %v925_v0, -inf }
 0x43c   : > { %930 = vmax.xlane.f32.xlu0 %v929_v2  ;;  %v863_v3 = vpop.f32.mrf.mxu0 }
 0x43d   : > { %v778_v4 = vpop.f32.mrf.mxu2  ;;  %v867_v5 = vsel %vm744_vm9, %v863_v3, -inf }
 0x43e   : > { %868 = vmax.xlane.f32.xlu2 %v867_v5 }
 0x442   : > { %v927_v6 = vpop.f32.mrf.mxu3 }
 0x443   : > { %v1447_v6 = vld [vmem:[%s1735_s3 + $0x8] sm:$0xff] }
 0x444   : > { %v865_v7 = vpop.f32.mrf.mxu0 }
 0x445   : > { %v801_v8 = vpop.f32.mrf.mxu2  ;;  %v1446_v7 = vld [vmem:[%s1735_s3] sm:$0xff] }
 0x446   : > { %v805_v10 = vsel %vm744_vm9, %v801_v8, -inf }
 0x447   : > { %806 = vmax.xlane.f32.xlu1 %v805_v10 }
 0x44d   : > { %v803_v11 = vpop.f32.mrf.mxu2 }
 0x44e   : > { %v1454_v11 = vld [vmem:[%s1745_s17 + $0x30] sm:$0xff] }
 0x456   : > { %941 = vrot.lane.b32.xlu2 %v1782_v36, %s1599_s14  ;;  %s1915_s14 = sld [smem:[#allocation7_spill]] }
 0x45c   : > { %s1917_s22 = sadd.s32 4294967295, %s1915_s14  }
 0x45d   : > { %p1460_p6 = scmp.eq.s32.totalorder %s1917_s22, 1 }
 0x4af   : > { %v931_v22 = vpop.xlane.xlu0 %930 }
 0x4b0   : > { %v932_v23 = vsub.f32 %v925_v0, %v931_v22 }
 0x4b1   : > { %v869_v12 = vpop.xlane.xlu2 %868 }
 0x4b2   : > { %v870_v13 = vsub.f32 %v863_v3, %v869_v12  ;;  %v933_v24 = vmul.f32 1.442695, %v932_v23 }
 0x4b4   : > { %v871_v14 = vmul.f32 1.442695, %v870_v13 }
 0x4b6   : > { %1518 = vpow2.f32 %v871_v14 }
 0x4b9   : > { %v942_v35 = vpop.permute.xlu2 %941 }
 0x4ba   : > { %v807_v15 = vpop.xlane.xlu1 %806  ;;  %v947_v39 = vsel %vm763_vm7, %v942_v35, 0 }
 0x4bb   : > { %v808_v16 = vsub.f32 %v801_v8, %v807_v15 }
 0x4bc   : > { %v1519_v17 = vpop.eup %1518 }
 0x4bd   : > { %v809_v18 = vmul.f32 1.442695, %v808_v16  ;;  %v873_v19 = vsel %vm744_vm9, %v1519_v17, 0.0 }
 0x4be   : > { %874 = vadd.xlane.f32.xlu0 %v873_v19 }
 0x4bf   : > { %1520 = vpow2.f32 %v809_v18 }
 0x4c0   : > { %1522 = vpow2.f32 %v933_v24 }
 0x4c5   : > { %v1521_v20 = vpop.eup %1520 }
 0x4c6   : > { %v811_v21 = vsel %vm744_vm9, %v1521_v20, 0.0  ;;  %v1523_v25 = vpop.eup %1522 }
 0x4c7   : > { %812 = vadd.xlane.f32.xlu1 %v811_v21  ;;  %v935_v26 = vsel %vm744_vm9, %v1523_v25, 0.0  ;;  %v1507_v21 = vld [vmem:[%s616_s23] ss:$0 sm:$0xff] }
 0x4d2   : > { %879 = vrot.lane.b32.xlu0 %v1782_v36, %s1600_s28 }
 0x4e0   : > { %817 = vrot.lane.b32.xlu1 %v1782_v36, %s1601_s29 }
 0x50a   : > { %936 = vadd.xlane.f32.xlu1 %v935_v26  ;;  %v1452_v26 = vld [vmem:[%s1745_s17 + $0x20] sm:$0xff] }
 0x531   : > { %v875_v27 = vpop.xlane.xlu0 %874 }
 0x532   : > { %1524 = vrcp.f32 %v875_v27  ;;  %v1451_v27 = vld [vmem:[%s1745_s17 + $0x18] sm:$0xff] }
 0x538   : > { %v1525_v28 = vpop.eup %1524 }
 0x539   : > { %v877_v29 = vmul.f32 %v1525_v28, %v1519_v17  ;;  %v1450_v28 = vld [vmem:[%s1745_s17 + $0x10] sm:$0xff] }
 0x53a   : > { %v813_v31 = vpop.xlane.xlu1 %812 }
 0x53b   : > { %v878_v33 = vpack.c.bf16 %v877_v29, %v877_v29  ;;  %1526 = vrcp.f32 %v813_v31  ;;  %v1449_v29 = vld [vmem:[%s1745_s17 + $0x8] sm:$0xff]  ;;  %v1508_v31 = vld [vmem:[%s624_s5] ss:$0 sm:$0xff]  ;;  %s1605_s5 = smov [#allocation3]  }
 0x53c   : > { %s1177_s29 = sshll.u32 %s1605_s5, 4  ;;  %s1178_s29 = int_to_ptr.vmem [resolvable:$true] %s1177_s29 }
 0x541   : > { %v1527_v34 = vpop.eup %1526 }
 0x542   : > { %v815_v36 = vmul.f32 %v1527_v34, %v1521_v20 }
 0x544   : > { %v880_v30 = vpop.permute.xlu0 %879  ;;  %v816_v40 = vpack.c.bf16 %v815_v36, %v815_v36 }
 0x545   : > { %v885_v32 = vsel %vm763_vm7, %v880_v30, 0  ;;  %v1448_v30 = vld [vmem:[%s1745_s17] sm:$0xff] }
 0x546   : > { %894 = vmatpush.bf16.msrb.mxu1 %v885_v32 }
 0x549   : > { %1381 = vmatmul.msk.bf16.vlgmr.msrb.gmra.mxu1 %vm759_vm10, %v878_v33 }
 0x54a   : > { %1069 = vmatpush.bf16.msra.mxu1 %v1447_v6 }
 0x54e   : > { %1070 = vmatpush.bf16.msra.mxu1 %v1446_v7 }
 0x552   : > { %v818_v37 = vpop.permute.xlu1 %817 }
 0x553   : > { %v823_v38 = vsel %vm763_vm7, %v818_v37, 0 }
 0x554   : > { %832 = vmatpush.bf16.msra.mxu2 %v823_v38 }
 0x557   : > { %1379 = vmatmul.msk.bf16.vlgmr.msra.gmra.mxu2 %vm759_vm10, %v816_v40 }
 0x558   : > { %956 = vmatpush.bf16.msrb.mxu2 %v947_v39 }
 0x57d   : > { %v937_v41 = vpop.xlane.xlu1 %936 }
 0x57e   : > { %1528 = vrcp.f32 %v937_v41 }
 0x584   : > { %v1529_v42 = vpop.eup %1528 }
 0x585   : > { %v939_v43 = vmul.f32 %v1529_v42, %v1523_v25  ;;  %v1453_v25 = vld [vmem:[%s1745_s17 + $0x28] sm:$0xff] }
 0x587   : > { %v940_v44 = vpack.c.bf16 %v939_v43, %v939_v43 }
 0x589   : > { %1383 = vmatmul.msk.bf16.vlgmr.msrb.gmra.mxu2 %vm759_vm10, %v940_v44 }
 0x5c6   : > { %v896_v45 = vpop.f32.mrf.mxu1 }
 0x5c7   : > { %901 = vrot.lane.b32.xlu0 %v896_v45, %s1602_s16  ;;  %v1509_v45 = vld [vmem:[%s632_s21] ss:$0 sm:$0xff] }
 0x5ce   : > { %v898_v46 = vpop.f32.mrf.mxu1 }
 0x5da   : > { %v834_v47 = vpop.f32.mrf.mxu2 }
 0x5db   : > { %839 = vrot.lane.b32.xlu2 %v834_v47, %s1603_s19  ;;  %s1916_s19 = sld [smem:[#allocation12_spill]] }
 0x5e2   : > { %v836_v48 = vpop.f32.mrf.mxu2 }
 0x60c   : > { %v958_v49 = vpop.f32.mrf.mxu2 }
 0x60d   : > { %963 = vrot.lane.b32.xlu2 %v958_v49, %s1604_s18  ;;  %s1179_s18 = sshll.u32 %s1916_s19, 4  ;;  %s1180_s18 = int_to_ptr.hbm [resolvable:$true] %s1179_s18 }
 0x614   : > { %v960_v50 = vpop.f32.mrf.mxu2 }
 0x635   : > { %v840_v52 = vpop.permute.xlu2 %839 }
 0x636   : > { %843 = vst.msk [vmem:[#allocation2] sm:$0xf] %vm842_vm12, %v840_v52 }
 0x639   : > { %v902_v53 = vpop.permute.xlu0 %901 }
 0x63a   : > { %905 = vst.msk [vmem:[#allocation2] sm:$0xf] %vm904_vm13, %v902_v53 }
 0x667   : > { %v964_v55 = vpop.permute.xlu2 %963 }
 0x668   : > { %967 = vst.msk [vmem:[#allocation2] sm:$0xf] %vm966_vm14, %v964_v55 }
 0x66f   : > { %v968_v56 = vld [vmem:[#allocation2] sm:$0xf] }
 0x670   : > { %v969_v57 = vpack.c.bf16 %v968_v56, %v968_v56 }
 0x672   : > { %1392 = vmatmul.msk.bf16.vlgmr.msra.gmra.mxu0 %vm703_vm6, %v969_v57 }
 0x6ef   : > { %v1002_v59 = vpop.f32.mrf.mxu0 }
 0x6f0   : > { %v1003_v60 = vadd.f32 %v1505_v58, %v1002_v59 }
 0x6f2   : > { %v1829_v61 = vadd.f32 %v1003_v60, %v1754_v1  ;;  %v1455_v1 = vld [vmem:[%s1745_s17 + $0x38] sm:$0xff] }
 0x6f3   : > { %1154 = vmatpush.bf16.msrb.mxu3 %v1455_v1 }
 0x6f4   : > { %v1009_v62 = vsel %vm644_vm1, %v1829_v61, 0.0 }
 0x6f5   : > { %1010 = vadd.xlane.f32.xlu0 %v1009_v62 }
 0x6f7   : > { %v1004_v63 = vpop.f32.mrf.mxu0  ;;  %1155 = vmatpush.bf16.msrb.mxu3 %v1454_v11 }
 0x6fb   : > { %1156 = vmatpush.bf16.msrb.mxu3 %v1453_v25 }
 0x6ff   : > { %1157 = vmatpush.bf16.msrb.mxu3 %v1452_v26 }
 0x703   : > { %1158 = vmatpush.bf16.msrb.mxu3 %v1451_v27 }
 0x707   : > { %1159 = vmatpush.bf16.msrb.mxu3 %v1450_v28 }
 0x70b   : > { %1160 = vmatpush.bf16.msrb.mxu3 %v1449_v29 }
 0x70f   : > { %1161 = vmatpush.bf16.msrb.mxu3 %v1448_v30 }
 0x768   : > { %v1011_v0 = vpop.xlane.xlu0 %1010 }
 0x769   : > { %v1012_v2 = vmul.f32 %v1011_v0, %v1758_v9 }
 0x76b   : > { %v1013_v3 = vsub.f32 %v1829_v61, %v1012_v2 }
 0x76d   : > { %v1014_v4 = vmul.f32 %v1013_v3, %v1013_v3 }
 0x76f   : > { %v1015_v5 = vsel %vm644_vm1, %v1014_v4, 0.0 }
 0x770   : > { %1016 = vadd.xlane.f32.xlu1 %v1015_v5 }
 0x7e3   : > { %v1017_v8 = vpop.xlane.xlu1 %1016 }
 0x7e4   : > { %v1018_v10 = vmul.f32 %v1017_v8, %v1758_v9  ;;  %v1506_v9 = vld [vmem:[%s613_s27] ss:$0 sm:$0xff] }
 0x7e6   : > { %v1019_v12 = vadd.f32 1e-06, %v1018_v10 }
 0x7e8   : > { %1530 = vrsqrt.f32 %v1019_v12  ;;  %vm1026_vm0 = vweird.f32 %v1019_v12 }
 0x7ee   : > { %v1531_v13 = vpop.eup %1530 }
 0x7ef   : > { %v1021_v14 = vmul.f32 %v1531_v13, %v1019_v12  ;;  %vm1027_vm15 = vweird.f32 %v1531_v13 }
 0x7f0   : > { %vm1028_vm2 = vmor %vm1026_vm0, %vm1027_vm15 }
 0x7f1   : > { %v1022_v15 = vmul.f32 %v1531_v13, %v1021_v14 }
 0x7f3   : > { %v1023_v16 = vmul.f32 0.5, %v1022_v15 }
 0x7f5   : > { %v1024_v17 = vsub.f32 1.5, %v1023_v16 }
 0x7f7   : > { %v1025_v18 = vmul.f32 %v1531_v13, %v1024_v17 }
 0x7f9   : > { %v1029_v19 = vsel %vm1028_vm2, %v1531_v13, %v1025_v18 }
 0x7fa   : > { %v1030_v20 = vmul.f32 %v1029_v19, %v1013_v3 }
 0x7fc   : > { %v1034_v22 = vmul.f32 %v1506_v9, %v1030_v20 }
 0x7fe   : > { %v1038_v23 = vadd.f32 %v1507_v21, %v1034_v22 }
 0x800   : > { %v1039_v24 = vpack.c.bf16 %v1038_v23, %v1038_v23 }
 0x802   : > { %1401 = vmatmul.msk.bf16.vlgmr.msra.gmra.mxu1 %vm703_vm6, %v1039_v24 }
 0x87f   : > { %v1072_v32 = vpop.f32.mrf.mxu1 }
 0x880   : > { %v1073_v33 = vadd.f32 %v1508_v31, %v1072_v32 }
 0x882   : > { %v1077_v34 = vmul.f32 0.044715, %v1073_v33  ;;  %v1076_v41 = vmul.f32 0.5, %v1073_v33 }
 0x884   : > { %v1078_v35 = vmul.f32 %v1077_v34, %v1073_v33 }
 0x886   : > { %v1079_v36 = vmul.f32 %v1078_v35, %v1073_v33 }
 0x887   : > { %v1074_v37 = vpop.f32.mrf.mxu1 }
 0x888   : > { %v1080_v38 = vadd.f32 %v1079_v36, %v1073_v33 }
 0x88a   : > { %v1081_v39 = vmul.f32 0.7978846, %v1080_v38 }
 0x88c   : > { %1532 = vtanh.f32 %v1081_v39 }
 0x892   : > { %v1533_v40 = vpop.eup %1532 }
 0x893   : > { %v1083_v42 = vadd.f32 1.0, %v1533_v40 }
 0x895   : > { %v1084_v43 = vmul.f32 %v1083_v42, %v1076_v41 }
 0x897   : > { %v1085_v44 = vpack.c.bf16 %v1084_v43, %v1084_v43 }
 0x899   : > { %1162 = vmatmul.bf16.vlgmr.msrb.gmra.mxu3 %v1085_v44 }
 0x91c   : > { %v1163_v46 = vpop.f32.mrf.mxu3 }
 0x91d   : > { %v1164_v47 = vadd.f32 %v1509_v45, %v1163_v46 }
 0x91f   : > { %v1167_v48 = vadd.f32 %v1164_v47, %v1829_v61 }
 0x921   : > { %1168 = vst.msk [vmem:[#allocation3] sm:$0xf] %vm644_vm1, %v1167_v48 }
 0x922   : > { %1457 = dma.vmem_to_hbm [thread:$0]  (%p1460_p6), %s1178_s29, 64, %s1180_s18, [#allocation4]  }
 0x924   : > { %v1165_v49 = vpop.f32.mrf.mxu3 }
 0x925   : > { %1575 = dma.done.wait (%p1460_p6), [#allocation4], 64  }
 0x926   : > { %1577 = vsyncadd (%p1460_p6), [#allocation4], 4294967232 }
 0x927 PF: > { %s1918_s30 = sld [smem:[#allocation7_spill]] }
 0x928   : > { %s1919_s25 = sld [smem:[#allocation6_spill]] }
 0x929   : > { %s1920_s26 = sld [smem:[#allocation8_spill]] }
 0x92d   : > { %s24_s27 = sadd.s32 1, %s1918_s30  }
 0x92e   : > { %p21_p7 = scmp.ge.s32.totalorder %s24_s27, 4  }
 0x930   :  { %23 = sbr.rel (!%p21_p7) target bundleno = 6 (0x6), region = 140 }
 0x935   :  { %1193 = vsyncpa [#allocation4], 1 }
 0x936   :  { %1195 = vsyncpa [#allocation4 + $0x1], 1 }

</bundles_post_ra>
